<compile_context>
chip_gen: v5e
topology: v5e:2x2
jax: 0.10.0
libtpu: 0.0.40
codegen_flags: <defaults>
</compile_context>

<pallas_src>
import functools

import jax
import jax.numpy as jnp
from jax.experimental import pallas as pl
from jax.experimental.pallas import tpu as pltpu


def _cdiv(a, b):
    return (a + b - 1) // b


def _round_up(n, m):
    return ((n + m - 1) // m) * m


def policy_net_kernel(x_ref, w1_ref, b1_ref, w2_ref, b2_ref, w3_ref, b3_ref,
                      out_ref):
    # x arrives f32 at its natural (tb, obs_size) width; cast in-kernel (VPU op,
    # hidden under the mem-bound pipeline).
    x = x_ref[...].astype(jnp.bfloat16)

    # l1 + relu  (bf16 MXU, f32 accumulate).  Hidden lanes beyond the real
    # hidden_size have zero weights/biases, so they stay exactly 0 through ReLU.
    h1 = jnp.dot(x, w1_ref[...], preferred_element_type=jnp.float32) + b1_ref[...]
    h1 = jnp.maximum(h1, 0.0).astype(jnp.bfloat16)

    # l2 + relu
    h2 = jnp.dot(h1, w2_ref[...], preferred_element_type=jnp.float32) + b2_ref[...]
    h2 = jnp.maximum(h2, 0.0).astype(jnp.bfloat16)

    # l3: w3/b3 carry exactly action_size output columns -> logits need no mask.
    logits = jnp.dot(h2, w3_ref[...], preferred_element_type=jnp.float32) + b3_ref[...]

    # Softmax over the action dim with exact normalization.
    m = jnp.max(logits, axis=1, keepdims=True)
    e = jnp.exp(logits - m)
    denom = jnp.sum(e, axis=1, keepdims=True)
    out_ref[...] = (e / denom).astype(out_ref.dtype)


def policy_net_forward(x, params, *, block_batch=1024):
    """x: (batch, obs_size) f32. Returns (batch, action_size) f32 softmax."""
    w1, b1 = params["w1"], params["b1"]
    w2, b2 = params["w2"], params["b2"]
    w3, b3 = params["w3"], params["b3"]
    obs_size = params["obs_size"]
    action_size = params["action_size"]
    hid_p = w1.shape[1]

    batch = x.shape[0]

    # Grid-step count: enough steps to keep tiles <= block_batch, and at least
    # 2 steps for mid-size batches so ("parallel",) shards across both v7x TCs.
    n_steps = _cdiv(batch, block_batch)
    if n_steps == 1 and batch > 512:
        n_steps = 2
    tb = _round_up(_cdiv(batch, n_steps), 8)   # adaptive tile, <=7 pad rows/step
    batch_p = n_steps * tb

    # Only minimal row padding (no lane padding, no dtype copy) on the host side.
    x_in = x if batch_p == batch else jnp.pad(x, ((0, batch_p - batch), (0, 0)))

    resident = lambda i: (0, 0)   # constant index_map -> weights stay in VMEM

    flops = 2 * batch_p * (obs_size * hid_p + hid_p * hid_p + hid_p * action_size)
    bytes_accessed = (
        x_in.size * x_in.dtype.itemsize
        + sum(a.size * a.dtype.itemsize for a in (w1, b1, w2, b2, w3, b3))
        + batch_p * action_size * 4
    )
    cost = pl.CostEstimate(flops=flops,
                           transcendentals=batch_p * action_size,
                           bytes_accessed=bytes_accessed)

    out = pl.pallas_call(
        policy_net_kernel,
        out_shape=jax.ShapeDtypeStruct((batch_p, action_size), jnp.float32),
        grid=(n_steps,),
        in_specs=[
            pl.BlockSpec((tb, obs_size), lambda i: (i, 0)),   # last dim == full dim
            pl.BlockSpec(w1.shape, resident),
            pl.BlockSpec(b1.shape, resident),
            pl.BlockSpec(w2.shape, resident),
            pl.BlockSpec(b2.shape, resident),
            pl.BlockSpec(w3.shape, resident),
            pl.BlockSpec(b3.shape, resident),
        ],
        out_specs=pl.BlockSpec((tb, action_size), lambda i: (i, 0)),
        compiler_params=pltpu.CompilerParams(
            dimension_semantics=("parallel",),   # both TensorCores on v7x
        ),
        cost_estimate=cost,
    )(x_in, w1, b1, w2, b2, w3, b3)

    return out[:batch] if batch_p != batch else out


def init_params(key, obs_size, action_size, hidden_size=100):
    """PyTorch-Linear-style init (uniform +-1/sqrt(fan_in)).

    Weights are stored transposed to (in, out) and cast to bf16.  Only the
    *hidden* dimension is padded to a 128-lane multiple (zeros), so padded
    hidden lanes stay exactly 0 through the ReLUs; the input (obs_size) and
    output (action_size) dims are kept at their natural widths so x and the
    softmax output carry no padded HBM bytes."""
    hid_p = _round_up(hidden_size, 128)

    def linear(key, fan_in, fan_out, in_store, out_store):
        kw, kb = jax.random.split(key)
        bound = 1.0 / (fan_in ** 0.5)
        w = jax.random.uniform(kw, (fan_in, fan_out), jnp.float32, -bound, bound)
        b = jax.random.uniform(kb, (fan_out,), jnp.float32, -bound, bound)
        w_p = jnp.zeros((in_store, out_store), jnp.float32)
        w_p = w_p.at[:fan_in, :fan_out].set(w)
        b_p = jnp.zeros((1, out_store), jnp.float32)
        b_p = b_p.at[0, :fan_out].set(b)
        return w_p.astype(jnp.bfloat16), b_p

    k1, k2, k3 = jax.random.split(key, 3)
    w1, b1 = linear(k1, obs_size, hidden_size, obs_size, hid_p)     # (obs, Hp)
    w2, b2 = linear(k2, hidden_size, hidden_size, hid_p, hid_p)     # (Hp, Hp)
    w3, b3 = linear(k3, hidden_size, action_size, hid_p, action_size)  # (Hp, A)
    return dict(w1=w1, b1=b1, w2=w2, b2=b2, w3=w3, b3=b3,
                obs_size=obs_size, action_size=action_size,
                hidden_size=hidden_size)


def reference_forward(x, params):
    """Pure-JAX reference doing the same (bf16 weights, f32 accumulate) math."""
    x_b = x.astype(jnp.bfloat16)
    h1 = jnp.dot(x_b, params["w1"], preferred_element_type=jnp.float32) + params["b1"]
    h1 = jnp.maximum(h1, 0.0).astype(jnp.bfloat16)
    h2 = jnp.dot(h1, params["w2"], preferred_element_type=jnp.float32) + params["b2"]
    h2 = jnp.maximum(h2, 0.0).astype(jnp.bfloat16)
    logits = jnp.dot(h2, params["w3"], preferred_element_type=jnp.float32) + params["b3"]
    return jax.nn.softmax(logits, axis=1)


if __name__ == "__main__":
    # Small shapes consistent with the module: x is (batch, obs_size).
    batch, obs_size, hidden_size, action_size = 8, 4, 32, 4

    key = jax.random.PRNGKey(0)
    kx, kp = jax.random.split(key)
    x = jax.random.normal(kx, (batch, obs_size), jnp.float32)
    params = init_params(kp, obs_size, action_size, hidden_size)

    out = jax.block_until_ready(policy_net_forward(x, params))
    ref = reference_forward(x, params)

    assert out.shape == (batch, action_size)
    assert jnp.allclose(out, ref, atol=1e-3, rtol=1e-3)
    assert jnp.allclose(jnp.sum(out, axis=1), jnp.ones((batch,)), atol=1e-3)

    # Multi-step batch grid with a ragged batch (adaptive tile + row padding).
    kx2, _ = jax.random.split(kx)
    x_big = jax.random.normal(kx2, (200, obs_size), jnp.float32)
    out_big = jax.block_until_ready(
        policy_net_forward(x_big, params, block_batch=64))
    ref_big = reference_forward(x_big, params)
    assert out_big.shape == (200, action_size)
    assert jnp.allclose(out_big, ref_big, atol=1e-3, rtol=1e-3)
    assert jnp.allclose(jnp.sum(out_big, axis=1), jnp.ones((200,)), atol=1e-3)

    print("KERNEL_OK")
</pallas_src>

<mosaic_0001>
module attributes {stable_mosaic.version = 11 : i64} {
  func.func @policy_net_kernel(%arg0: i32, %arg1: memref<8x4xf32, #tpu.memory_space<vmem>>, %arg2: memref<4x128xbf16, #tpu.memory_space<vmem>>, %arg3: memref<1x128xf32, #tpu.memory_space<vmem>>, %arg4: memref<128x128xbf16, #tpu.memory_space<vmem>>, %arg5: memref<1x128xf32, #tpu.memory_space<vmem>>, %arg6: memref<128x4xbf16, #tpu.memory_space<vmem>>, %arg7: memref<1x4xf32, #tpu.memory_space<vmem>>, %arg8: memref<8x4xf32, #tpu.memory_space<vmem>>) attributes {dimension_semantics = [#tpu.dimension_semantics<parallel>], iteration_bounds = array<i64: 1>, scalar_prefetch = 0 : i64, scratch_operands = 0 : i64, tpu.core_type = #tpu.core_type<tc>, window_params = [{transform_indices = @transform_0, window_bounds = array<i64: 8, 4>}, {pipeline_mode = #tpu.pipeline_mode<synchronous>, transform_indices = @transform_1, window_bounds = array<i64: 4, 128>}, {pipeline_mode = #tpu.pipeline_mode<synchronous>, transform_indices = @transform_2, window_bounds = array<i64: 1, 128>}, {pipeline_mode = #tpu.pipeline_mode<synchronous>, transform_indices = @transform_3, window_bounds = array<i64: 128, 128>}, {pipeline_mode = #tpu.pipeline_mode<synchronous>, transform_indices = @transform_4, window_bounds = array<i64: 1, 128>}, {pipeline_mode = #tpu.pipeline_mode<synchronous>, transform_indices = @transform_5, window_bounds = array<i64: 128, 4>}, {pipeline_mode = #tpu.pipeline_mode<synchronous>, transform_indices = @transform_6, window_bounds = array<i64: 1, 4>}, {transform_indices = @transform_7, window_bounds = array<i64: 8, 4>}]} {
    %c0 = arith.constant 0 : index
    %c0_0 = arith.constant 0 : index
    %0 = vector.load %arg1[%c0, %c0_0] : memref<8x4xf32, #tpu.memory_space<vmem>>, vector<8x4xf32>
    %1 = arith.truncf %0 : vector<8x4xf32> to vector<8x4xbf16>
    %c0_1 = arith.constant 0 : index
    %c0_2 = arith.constant 0 : index
    %2 = vector.load %arg2[%c0_1, %c0_2] : memref<4x128xbf16, #tpu.memory_space<vmem>>, vector<4x128xbf16>
    %cst = arith.constant dense<0.000000e+00> : vector<8x128xf32>
    %3 = tpu.matmul %1, %2, %cst {dimension_numbers = #tpu.dot_dimension_numbers<[1], [0], [0], [1], [0, 0, 1, 1], [], []>} : vector<8x4xbf16>, vector<4x128xbf16>, vector<8x128xf32> -> vector<8x128xf32>
    %c0_3 = arith.constant 0 : index
    %c0_4 = arith.constant 0 : index
    %4 = vector.load %arg3[%c0_3, %c0_4] : memref<1x128xf32, #tpu.memory_space<vmem>>, vector<1x128xf32>
    %5 = vector.broadcast %4 : vector<1x128xf32> to vector<8x128xf32>
    %6 = arith.addf %3, %5 : vector<8x128xf32>
    %cst_5 = arith.constant 0.000000e+00 : f32
    %7 = vector.broadcast %cst_5 : f32 to vector<8x128xf32>
    %8 = arith.maximumf %6, %7 : vector<8x128xf32>
    %9 = arith.truncf %8 : vector<8x128xf32> to vector<8x128xbf16>
    %c0_6 = arith.constant 0 : index
    %c0_7 = arith.constant 0 : index
    %10 = vector.load %arg4[%c0_6, %c0_7] : memref<128x128xbf16, #tpu.memory_space<vmem>>, vector<128x128xbf16>
    %cst_8 = arith.constant dense<0.000000e+00> : vector<8x128xf32>
    %11 = tpu.matmul %9, %10, %cst_8 {dimension_numbers = #tpu.dot_dimension_numbers<[1], [0], [0], [1], [0, 0, 1, 1], [], []>} : vector<8x128xbf16>, vector<128x128xbf16>, vector<8x128xf32> -> vector<8x128xf32>
    %c0_9 = arith.constant 0 : index
    %c0_10 = arith.constant 0 : index
    %12 = vector.load %arg5[%c0_9, %c0_10] : memref<1x128xf32, #tpu.memory_space<vmem>>, vector<1x128xf32>
    %13 = vector.broadcast %12 : vector<1x128xf32> to vector<8x128xf32>
    %14 = arith.addf %11, %13 : vector<8x128xf32>
    %cst_11 = arith.constant 0.000000e+00 : f32
    %15 = vector.broadcast %cst_11 : f32 to vector<8x128xf32>
    %16 = arith.maximumf %14, %15 : vector<8x128xf32>
    %17 = arith.truncf %16 : vector<8x128xf32> to vector<8x128xbf16>
    %c0_12 = arith.constant 0 : index
    %c0_13 = arith.constant 0 : index
    %18 = vector.load %arg6[%c0_12, %c0_13] : memref<128x4xbf16, #tpu.memory_space<vmem>>, vector<128x4xbf16>
    %cst_14 = arith.constant dense<0.000000e+00> : vector<8x4xf32>
    %19 = tpu.matmul %17, %18, %cst_14 {dimension_numbers = #tpu.dot_dimension_numbers<[1], [0], [0], [1], [0, 0, 1, 1], [], []>} : vector<8x128xbf16>, vector<128x4xbf16>, vector<8x4xf32> -> vector<8x4xf32>
    %c0_15 = arith.constant 0 : index
    %c0_16 = arith.constant 0 : index
    %20 = vector.load %arg7[%c0_15, %c0_16] : memref<1x4xf32, #tpu.memory_space<vmem>>, vector<1x4xf32>
    %21 = vector.broadcast %20 : vector<1x4xf32> to vector<8x4xf32>
    %22 = arith.addf %19, %21 : vector<8x4xf32>
    %cst_17 = arith.constant dense<0xFF800000> : vector<8xf32>
    %23 = vector.multi_reduction <maximumf>, %22, %cst_17 [1] : vector<8x4xf32> to vector<8xf32>
    %24 = vector.shape_cast %23 : vector<8xf32> to vector<8x1xf32>
    %25 = vector.broadcast %24 : vector<8x1xf32> to vector<8x4xf32>
    %26 = arith.subf %22, %25 : vector<8x4xf32>
    %27 = math.exp %26 : vector<8x4xf32>
    %cst_18 = arith.constant dense<0.000000e+00> : vector<8xf32>
    %28 = vector.multi_reduction <add>, %27, %cst_18 [1] : vector<8x4xf32> to vector<8xf32>
    %29 = vector.shape_cast %28 : vector<8xf32> to vector<8x1xf32>
    %30 = vector.broadcast %29 : vector<8x1xf32> to vector<8x4xf32>
    %31 = arith.divf %27, %30 : vector<8x4xf32>
    %c0_19 = arith.constant 0 : index
    %c0_20 = arith.constant 0 : index
    %32 = vector.load %arg8[%c0_19, %c0_20] : memref<8x4xf32, #tpu.memory_space<vmem>>, vector<8x4xf32>
    tpu.vector_store %arg8[%c0_19, %c0_20], %31 {strides = array<i32>} : memref<8x4xf32, #tpu.memory_space<vmem>>, vector<8x4xf32>,
    return
  }
  func.func @transform_0(%arg0: i32) -> (i32, i32) {
    %c0_i32 = arith.constant 0 : i32
    %c0_i32_0 = arith.constant 0 : i32
    return %arg0, %c0_i32 : i32, i32
  }
  func.func @transform_1(%arg0: i32) -> (i32, i32) {
    %c0_i32 = arith.constant 0 : i32
    %c0_i32_0 = arith.constant 0 : i32
    %c0_i32_1 = arith.constant 0 : i32
    return %c0_i32, %c0_i32_0 : i32, i32
  }
  func.func @transform_2(%arg0: i32) -> (i32, i32) {
    %c0_i32 = arith.constant 0 : i32
    %c0_i32_0 = arith.constant 0 : i32
    %c0_i32_1 = arith.constant 0 : i32
    return %c0_i32, %c0_i32_0 : i32, i32
  }
  func.func @transform_3(%arg0: i32) -> (i32, i32) {
    %c0_i32 = arith.constant 0 : i32
    %c0_i32_0 = arith.constant 0 : i32
    %c0_i32_1 = arith.constant 0 : i32
    return %c0_i32, %c0_i32_0 : i32, i32
  }
  func.func @transform_4(%arg0: i32) -> (i32, i32) {
    %c0_i32 = arith.constant 0 : i32
    %c0_i32_0 = arith.constant 0 : i32
    %c0_i32_1 = arith.constant 0 : i32
    return %c0_i32, %c0_i32_0 : i32, i32
  }
  func.func @transform_5(%arg0: i32) -> (i32, i32) {
    %c0_i32 = arith.constant 0 : i32
    %c0_i32_0 = arith.constant 0 : i32
    %c0_i32_1 = arith.constant 0 : i32
    return %c0_i32, %c0_i32_0 : i32, i32
  }
  func.func @transform_6(%arg0: i32) -> (i32, i32) {
    %c0_i32 = arith.constant 0 : i32
    %c0_i32_0 = arith.constant 0 : i32
    %c0_i32_1 = arith.constant 0 : i32
    return %c0_i32, %c0_i32_0 : i32, i32
  }
  func.func @transform_7(%arg0: i32) -> (i32, i32) {
    %c0_i32 = arith.constant 0 : i32
    %c0_i32_0 = arith.constant 0 : i32
    return %arg0, %c0_i32 : i32, i32
  }
}

</mosaic_0001>

<bundles_post_ra>
// kernel: tpu_custom_call.1
= control target key start
LH: loop header
LB: loop body
LE: loop exit
PB: predicated region body
PF: predicated region fallthrough
CT: control target
= control target key end

     0   :  { %vm38_vm0 = vcmask 1041408   ;;  %vm34_vm1 = vcmask 31744   ;;  %s448_s1 = inlined_call_operand.vmem [shape: bf16[4,128], index: 1, kind: input, shape index: {}]   ;;  %s449_s0 = inlined_call_operand.vmem [shape: f32[8,4], index: 0, kind: input, shape index: {}]   ;;  %s450_s3 = inlined_call_operand.vmem [shape: bf16[128,128], index: 3, kind: input, shape index: {}]   ;;  %s451_s2 = inlined_call_operand.vmem [shape: f32[1,128], index: 2, kind: input, shape index: {}]   ;;  %s452_s4 = inlined_call_operand.vmem [shape: f32[1,128], index: 4, kind: input, shape index: {}]   ;;  %s453_s5 = inlined_call_operand.vmem [shape: bf16[128,4], index: 5, kind: input, shape index: {}]   ;;  %s454_s6 = inlined_call_operand.vmem [shape: f32[1,4], index: 6, kind: input, shape index: {}]   ;;  %s455_s7 = inlined_call_operand.vmem [shape: f32[8,4], index: 7, kind: output, shape index: {}]  }
   0x1   :  { %v29_v0 = vld [vmem:[%s448_s1] sm:$0x3]  ;;  %v322_v2 = vld [vmem:[%s450_s3 + $0x38] sm:$0xff]  ;;  %v321_v5 = vld [vmem:[%s450_s3 + $0x30] sm:$0xff] }
   0x2   :  { %v27_v1 = vld [vmem:[%s449_s0] sm:$0xff]  ;;  %v40_v3 = vsel %vm38_vm0, %v29_v0, 0  ;;  %125 = vmatpush.bf16.msra.mxu1 %v322_v2  ;;  %v320_v6 = vld [vmem:[%s450_s3 + $0x28] sm:$0xff]  ;;  %v318_v8 = vld [vmem:[%s450_s3 + $0x18] sm:$0xff] }
   0x3   :  { %v28_v4 = vpack.c.bf16 %v27_v1, %v27_v1  ;;  %49 = vmatpush.bf16.msra.mxu0 %v40_v3  ;;  %v319_v7 = vld [vmem:[%s450_s3 + $0x20] sm:$0xff]  ;;  %v317_v9 = vld [vmem:[%s450_s3 + $0x10] sm:$0xff]  ;;  %v316_v10 = vld [vmem:[%s450_s3 + $0x8] sm:$0xff] }
   0x4   :  { %v315_v11 = vld [vmem:[%s450_s3] sm:$0xff]  ;;  %v330_v12 = vld [vmem:[%s453_s5 + $0x38] sm:$0xff]  ;;  %v329_v13 = vld [vmem:[%s453_s5 + $0x30] sm:$0xff] }
   0x5   :  { %208 = vmatpush.bf16.msra.mxu2 %v330_v12  ;;  %v328_v14 = vld [vmem:[%s453_s5 + $0x28] sm:$0xff]  ;;  %v327_v15 = vld [vmem:[%s453_s5 + $0x20] sm:$0xff]  ;;  %v326_v16 = vld [vmem:[%s453_s5 + $0x18] sm:$0xff] }
   0x6   :  { %250 = vmatmul.msk.bf16.vlgmr.msra.gmra.mxu0 %vm34_vm1, %v28_v4  ;;  %126 = vmatpush.bf16.msra.mxu1 %v321_v5  ;;  %v325_v17 = vld [vmem:[%s453_s5 + $0x10] sm:$0xff]  ;;  %v331_v18 = vld [vmem:[%s451_s2] ss:$0 sm:$0xff]  ;;  %v324_v24 = vld [vmem:[%s453_s5 + $0x8] sm:$0xff] }
   0x7   :  { %v323_v25 = vld [vmem:[%s453_s5] sm:$0xff] }
   0x8   :  { %v332_v26 = vld [vmem:[%s452_s4] ss:$0 sm:$0xff] }
   0x9   :  { %209 = vmatpush.bf16.msra.mxu2 %v329_v13  ;;  %v333_v32 = vld [vmem:[%s454_s6] ss:$0 sm:$0xff] }
   0xa   :  { %127 = vmatpush.bf16.msra.mxu1 %v320_v6 }
   0xd   :  { %210 = vmatpush.bf16.msra.mxu2 %v328_v14 }
   0xe   :  { %128 = vmatpush.bf16.msra.mxu1 %v319_v7 }
  0x11   :  { %211 = vmatpush.bf16.msra.mxu2 %v327_v15 }
  0x12   :  { %129 = vmatpush.bf16.msra.mxu1 %v318_v8 }
  0x15   :  { %212 = vmatpush.bf16.msra.mxu2 %v326_v16 }
  0x16   :  { %130 = vmatpush.bf16.msra.mxu1 %v317_v9 }
  0x19   :  { %213 = vmatpush.bf16.msra.mxu2 %v325_v17 }
  0x1a   :  { %131 = vmatpush.bf16.msra.mxu1 %v316_v10 }
  0x1d   :  { %214 = vmatpush.bf16.msra.mxu2 %v324_v24 }
  0x1e   :  { %132 = vmatpush.bf16.msra.mxu1 %v315_v11 }
  0x21   :  { %215 = vmatpush.bf16.msra.mxu2 %v323_v25 }
  0x83   :  { %v51_v19 = vpop.f32.mrf.mxu0 }
  0x84   :  { %v52_v20 = vadd.f32 %v331_v18, %v51_v19 }
  0x86   :  { %v55_v21 = vmax.f32 %v52_v20, 0.0 }
  0x88   :  { %v56_v22 = vpack.c.bf16 %v55_v21, %v55_v21 }
  0x8a   :  { %133 = vmatmul.bf16.vlgmr.msra.gmra.mxu1 %v56_v22 }
  0x8b   :  { %v53_v23 = vpop.f32.mrf.mxu0 }
 0x107   :  { %v134_v27 = vpop.f32.mrf.mxu1 }
 0x108   :  { %v135_v28 = vadd.f32 %v332_v26, %v134_v27 }
 0x10a   :  { %v138_v29 = vmax.f32 %v135_v28, 0.0 }
 0x10c   :  { %v139_v30 = vpack.c.bf16 %v138_v29, %v138_v29 }
 0x10e   :  { %216 = vmatmul.bf16.vlgmr.msra.gmra.mxu2 %v139_v30 }
 0x10f   :  { %v136_v31 = vpop.f32.mrf.mxu1 }
 0x191   :  { %v217_v33 = vpop.f32.mrf.mxu2 }
 0x192   :  { %v218_v34 = vadd.f32 %v333_v32, %v217_v33 }
 0x194   :  { %v221_v35 = vsel %vm34_vm1, %v218_v34, -inf }
 0x195   :  { %222 = vmax.xlane.f32.xlu0 %v221_v35 }
 0x199   :  { %v219_v36 = vpop.f32.mrf.mxu2 }
 0x208   :  { %v223_v37 = vpop.xlane.xlu0 %222 }
 0x209   :  { %v224_v38 = vsub.f32 %v218_v34, %v223_v37 }
 0x20b   :  { %v225_v39 = vmul.f32 1.442695, %v224_v38 }
 0x20d   :  { %334 = vpow2.f32 %v225_v39 }
 0x213   :  { %v335_v40 = vpop.eup %334 }
 0x214   :  { %v227_v41 = vsel %vm34_vm1, %v335_v40, 0.0 }
 0x215   :  { %228 = vadd.xlane.f32.xlu0 %v227_v41 }
 0x288   :  { %v229_v42 = vpop.xlane.xlu0 %228 }
 0x289   :  { %336 = vrcp.f32 %v229_v42  ;;  %v241_v46 = vand.u32 2147483648, %v229_v42  ;;  %v239_v48 = vand.u32 2147483647, %v229_v42  ;;  %vm235_vm3 = vweird.f32 %v229_v42 }
 0x28b   :  { %v242_v50 = vor.u32 1.1754944e-38, %v241_v46  ;;  %vm240_vm5 = vcmp.eq.f32.partialorder %v239_v48, 8.507059e+37 }
 0x28f   :  { %v337_v43 = vpop.eup %336 }
 0x290   :  { %v231_v44 = vmul.f32 %v337_v43, %v229_v42  ;;  %vm236_vm2 = vweird.f32 %v337_v43 }
 0x291   :  { %vm237_vm4 = vmor %vm235_vm3, %vm236_vm2 }
 0x292   :  { %v232_v45 = vsub.f32 1.0, %v231_v44 }
 0x294   :  { %v233_v47 = vmul.f32 %v337_v43, %v232_v45 }
 0x296   :  { %v234_v49 = vadd.f32 %v337_v43, %v233_v47 }
 0x298   :  { %v238_v51 = vsel %vm237_vm4, %v337_v43, %v234_v49 }
 0x299   :  { %v243_v52 = vsel %vm240_vm5, %v242_v50, %v238_v51 }
 0x29a   :  { %v244_v53 = vmul.f32 %v335_v40, %v243_v52 }
 0x29c   :  { %245 = vst.msk [vmem:[%s455_s7] sm:$0xff] %vm34_vm1, %v244_v53 }

</bundles_post_ra>
